<compile_context>
chip_gen: v5e
topology: v5e:2x2
jax: 0.10.0
libtpu: 0.0.40
codegen_flags: <defaults>
</compile_context>

<pallas_src>
import functools

import jax
import jax.numpy as jnp
from jax.experimental import pallas as pl
from jax.experimental.pallas import tpu as pltpu


_FAST_PATH_BYTES = 2 << 20      # per-batch C*HW footprint below which we use 1 block/batch
_TILE_TARGET_BYTES = 4 << 20    # (C, T) tile target for the tiled streaming path
_CACHE_BUDGET_BYTES = 24 << 20  # per-batch VMEM x-cache budget (v7x-safe)
_VMEM_LIMIT_BYTES = 48 << 20    # scoped VMEM limit for the tiled path


def _cdiv(a, b):
    return -(-a // b)


def _round_up(a, b):
    return _cdiv(a, b) * b


def _sigmoid(z):
    # Explicit form; lowers cleanly to EUP exp + VPU add/div in Mosaic.
    return 1.0 / (1.0 + jnp.exp(-z))


def _gate_from_sum(sum_c1, w1t, w2, inv_hw):
    """Squeeze/excite gate from per-channel spatial sums.
    sum_c1: (C, 1) f32;  w1t: (C, Cr) f32;  w2: (C, Cr) f32  ->  (C, 1) f32."""
    mean = sum_c1 * inv_hw                                              # (C, 1)
    # h_j = relu(sum_c W1[j, c] * mean_c): VPU mul + XLU sublane reduce.
    h = jnp.maximum(jnp.sum(w1t * mean, axis=0, keepdims=True), 0.0)    # (1, Cr)
    # g_c = sigmoid(sum_j W2[c, j] * h_j): VPU mul + XLU lane reduce.
    return _sigmoid(jnp.sum(w2 * h, axis=-1, keepdims=True))            # (C, 1)


def _fast_kernel(x_ref, w1t_ref, w2_ref, o_ref, *, inv_hw):
    # x_ref/o_ref block: (1, C, HW); weights full blocks (C, Cr).
    xt = x_ref[0]                                                       # (C, HW)
    s = jnp.sum(xt, axis=-1, keepdims=True, dtype=jnp.float32)          # (C, 1)
    g = _gate_from_sum(s, w1t_ref[...], w2_ref[...], inv_hw)
    o_ref[0] = xt * g.astype(xt.dtype)


def _fused_kernel(x_ref, w1t_ref, w2_ref, o_ref, acc_ref, cache_ref=None, *,
                  inv_hw, use_cache):
    # grid = (B, 2 phases, n_t HW tiles); x_ref/o_ref block: (1, C, T).
    phase = pl.program_id(1)
    t = pl.program_id(2)

    @pl.when(jnp.logical_and(phase == 0, t == 0))
    def _():
        acc_ref[...] = jnp.zeros_like(acc_ref)

    @pl.when(phase == 0)
    def _():
        xt = x_ref[0]
        # Accumulate in f32 with the cast fused into the reduce (no full-tile astype).
        acc_ref[...] += jnp.sum(xt, axis=-1, keepdims=True, dtype=jnp.float32)
        if use_cache:
            cache_ref[t] = xt

    @pl.when(jnp.logical_and(phase == 1, t == 0))
    def _():
        # In-kernel gate MLP: mean -> W1 -> ReLU -> W2 -> sigmoid (stored over acc).
        acc_ref[...] = _gate_from_sum(
            acc_ref[...], w1t_ref[...], w2_ref[...], inv_hw)

    @pl.when(phase == 1)
    def _():
        xt = cache_ref[t] if use_cache else x_ref[0]
        o_ref[0] = xt * acc_ref[...].astype(xt.dtype)


def _pick_hw_tile(hw, c, itemsize, target_bytes):
    """HW tile T (multiple of 128), tile count n_t, padded HW = T * n_t."""
    hw128 = _round_up(hw, 128)
    max_lanes = max(128, (target_bytes // max(1, c * itemsize)) // 128 * 128)
    n_t = max(1, _cdiv(hw128, max_lanes))
    t = _round_up(_cdiv(hw128, n_t), 128)
    return t, n_t, t * n_t


def spectral_attention_pallas(x_nchw, w1, w2, *, force_tiled=False,
                              force_no_cache=False, tile_bytes=None):
    """x_nchw: (B, C, H, W).
    w1: (C//r, C) -- weight of first 1x1 conv (out, in), squeezed.
    w2: (C, C//r) -- weight of second 1x1 conv (out, in), squeezed."""
    B, C, H, W = x_nchw.shape
    HW = H * W
    itemsize = x_nchw.dtype.itemsize
    Cr = w1.shape[0]

    x3 = x_nchw.reshape(B, C, HW)                # free view: native NCHW, HW on lanes
    w1t = jnp.asarray(w1, jnp.float32).T         # (C, Cr)
    w2f = jnp.asarray(w2, jnp.float32)           # (C, Cr)
    inv_hw = float(1.0 / HW)

    # --- Small-shape fast path: one block per batch, one launch, 1 read + 1 write. ---
    if (not force_tiled) and C * HW * itemsize <= _FAST_PATH_BYTES:
        out = pl.pallas_call(
            functools.partial(_fast_kernel, inv_hw=inv_hw),
            out_shape=jax.ShapeDtypeStruct((B, C, HW), x3.dtype),
            grid_spec=pltpu.PrefetchScalarGridSpec(
                num_scalar_prefetch=0,
                grid=(B,),
                in_specs=[
                    pl.BlockSpec((1, C, HW), lambda b: (b, 0, 0)),
                    pl.BlockSpec((C, Cr), lambda b: (0, 0)),
                    pl.BlockSpec((C, Cr), lambda b: (0, 0)),
                ],
                out_specs=pl.BlockSpec((1, C, HW), lambda b: (b, 0, 0)),
            ),
            compiler_params=pltpu.CompilerParams(
                dimension_semantics=("parallel",),
                vmem_limit_bytes=32 << 20),
        )(x3, w1t, w2f)
        return out.reshape(B, C, H, W)

    # --- Tiled fused path: grid = (B, 2 phases, HW tiles). ---
    target = _TILE_TARGET_BYTES if tile_bytes is None else tile_bytes
    T, n_t, HWp = _pick_hw_tile(HW, C, itemsize, target)
    if HWp != HW:
        # Zero padding: contributes 0 to the spatial sum; sliced off the output.
        x3 = jnp.pad(x3, ((0, 0), (0, 0), (0, HWp - HW)))

    use_cache = (not force_no_cache) and (C * HWp * itemsize <= _CACHE_BUDGET_BYTES)

    if use_cache:
        # Phase 1 reads x tiles from the VMEM cache; pin the x block index to the
        # last phase-0 tile so no new input DMA is issued during phase 1.
        x_map = lambda b, p, t: (b, 0, t * (1 - p) + (n_t - 1) * p)
    else:
        x_map = lambda b, p, t: (b, 0, t)

    scratch = [pltpu.VMEM((C, 1), jnp.float32)]             # sums -> gate
    if use_cache:
        scratch.append(pltpu.VMEM((n_t, C, T), x3.dtype))   # per-batch x cache

    # Perf note: for B == 1 on v7x the "parallel" B axis leaves one TensorCore
    # idle during the reduction phase; splitting the HW axis into two parallel
    # partial sums would rebalance it (not needed for the shapes tested here).
    out = pl.pallas_call(
        functools.partial(_fused_kernel, inv_hw=inv_hw, use_cache=use_cache),
        out_shape=jax.ShapeDtypeStruct((B, C, HWp), x3.dtype),
        grid_spec=pltpu.PrefetchScalarGridSpec(
            num_scalar_prefetch=0,
            grid=(B, 2, n_t),
            in_specs=[
                pl.BlockSpec((1, C, T), x_map),
                pl.BlockSpec((C, Cr), lambda b, p, t: (0, 0)),
                pl.BlockSpec((C, Cr), lambda b, p, t: (0, 0)),
            ],
            # Phase 0 never writes the output; pin its block index to tile 0 so
            # no spurious HBM writeback happens before phase 1 fills it.
            out_specs=pl.BlockSpec((1, C, T), lambda b, p, t: (b, 0, p * t)),
            scratch_shapes=scratch,
        ),
        compiler_params=pltpu.CompilerParams(
            dimension_semantics=("parallel", "arbitrary", "arbitrary"),
            vmem_limit_bytes=_VMEM_LIMIT_BYTES),
        # NOTE: with a caller-donated x (and HWp == HW), input_output_aliases={0: 0}
        # would turn this into an in-place scale and save the output allocation.
    )(x3, w1t, w2f)

    if HWp != HW:
        out = out[:, :, :HW]
    return out.reshape(B, C, H, W)


def spectral_attention_ref(x_nchw, w1, w2):
    """Pure-JAX reference matching the PyTorch module."""
    y = jnp.mean(x_nchw, axis=(2, 3))                     # (B, C)
    h = jnp.maximum(y @ w1.T, 0.0)                        # (B, C//r)
    g = jax.nn.sigmoid(h @ w2.T)                          # (B, C)
    return x_nchw * g[:, :, None, None]


if __name__ == "__main__":
    # Small shapes consistent with the module: in_channels=32, reduction=8.
    B, C, H, W = 2, 32, 16, 16
    reduction = 8
    Cr = C // reduction

    key = jax.random.PRNGKey(0)
    kx, k1, k2 = jax.random.split(key, 3)
    x = jax.random.normal(kx, (B, C, H, W), dtype=jnp.float32)
    # Conv2d(C, C//r, 1, bias=False).weight has shape (C//r, C, 1, 1); keep the
    # squeezed matrices.  Deterministic init from PRNGKey(0).
    w1 = jax.random.normal(k1, (Cr, C), dtype=jnp.float32) * 0.1
    w2 = jax.random.normal(k2, (C, Cr), dtype=jnp.float32) * 0.1

    ref = spectral_attention_ref(x, w1, w2)

    # 1) Small-shape fast path (single fused block per batch).
    out_fast = jax.block_until_ready(spectral_attention_pallas(x, w1, w2))
    assert out_fast.shape == (B, C, H, W)
    assert jnp.allclose(out_fast, ref, atol=1e-5, rtol=1e-5), (
        float(jnp.max(jnp.abs(out_fast - ref))))

    # 2) Tiled fused path with VMEM x-cache (forced small tiles -> 2 HW tiles).
    out_cache = jax.block_until_ready(
        spectral_attention_pallas(x, w1, w2, force_tiled=True,
                                  tile_bytes=128 * C * 4))
    assert jnp.allclose(out_cache, ref, atol=1e-5, rtol=1e-5), (
        float(jnp.max(jnp.abs(out_cache - ref))))

    # 3) Tiled fused path, streaming (no VMEM cache, re-reads x in phase 1).
    out_stream = jax.block_until_ready(
        spectral_attention_pallas(x, w1, w2, force_tiled=True,
                                  force_no_cache=True, tile_bytes=128 * C * 4))
    assert jnp.allclose(out_stream, ref, atol=1e-5, rtol=1e-5), (
        float(jnp.max(jnp.abs(out_stream - ref))))

    # 4) Non-128 spatial extent: fast path (masked lanes) and tiled path (zero pad).
    x2 = jax.random.normal(kx, (1, C, 10, 10), dtype=jnp.float32)
    ref2 = spectral_attention_ref(x2, w1, w2)
    out2f = jax.block_until_ready(spectral_attention_pallas(x2, w1, w2))
    assert jnp.allclose(out2f, ref2, atol=1e-5, rtol=1e-5), (
        float(jnp.max(jnp.abs(out2f - ref2))))
    out2t = jax.block_until_ready(
        spectral_attention_pallas(x2, w1, w2, force_tiled=True))
    assert jnp.allclose(out2t, ref2, atol=1e-5, rtol=1e-5), (
        float(jnp.max(jnp.abs(out2t - ref2))))

    print("KERNEL_OK")
</pallas_src>

<mosaic_0001>
module attributes {stable_mosaic.version = 11 : i64} {
  func.func @_fast_kernel(%arg0: i32, %arg1: memref<1x32x256xf32, #tpu.memory_space<vmem>>, %arg2: memref<32x4xf32, #tpu.memory_space<vmem>>, %arg3: memref<32x4xf32, #tpu.memory_space<vmem>>, %arg4: memref<1x32x256xf32, #tpu.memory_space<vmem>>) attributes {dimension_semantics = [#tpu.dimension_semantics<parallel>], iteration_bounds = array<i64: 2>, scalar_prefetch = 0 : i64, scratch_operands = 0 : i64, tpu.core_type = #tpu.core_type<tc>, window_params = [{transform_indices = @transform_0, window_bounds = array<i64: 1, 32, 256>}, {pipeline_mode = #tpu.pipeline_mode<synchronous>, transform_indices = @transform_1, window_bounds = array<i64: 32, 4>}, {pipeline_mode = #tpu.pipeline_mode<synchronous>, transform_indices = @transform_2, window_bounds = array<i64: 32, 4>}, {transform_indices = @transform_3, window_bounds = array<i64: 1, 32, 256>}]} {
    %c0 = arith.constant 0 : index
    %c0_0 = arith.constant 0 : index
    %c0_1 = arith.constant 0 : index
    %0 = vector.load %arg1[%c0, %c0_0, %c0_1] : memref<1x32x256xf32, #tpu.memory_space<vmem>>, vector<1x32x256xf32>
    %1 = vector.shape_cast %0 : vector<1x32x256xf32> to vector<32x256xf32>
    %cst = arith.constant dense<0.000000e+00> : vector<32xf32>
    %2 = vector.multi_reduction <add>, %1, %cst [1] : vector<32x256xf32> to vector<32xf32>
    %3 = vector.shape_cast %2 : vector<32xf32> to vector<32x1xf32>
    %c0_2 = arith.constant 0 : index
    %c0_3 = arith.constant 0 : index
    %4 = vector.load %arg2[%c0_2, %c0_3] : memref<32x4xf32, #tpu.memory_space<vmem>>, vector<32x4xf32>
    %c0_4 = arith.constant 0 : index
    %c0_5 = arith.constant 0 : index
    %5 = vector.load %arg3[%c0_4, %c0_5] : memref<32x4xf32, #tpu.memory_space<vmem>>, vector<32x4xf32>
    %cst_6 = arith.constant 3.906250e-03 : f32
    %6 = vector.broadcast %cst_6 : f32 to vector<32x1xf32>
    %7 = arith.mulf %3, %6 : vector<32x1xf32>
    %8 = vector.broadcast %7 : vector<32x1xf32> to vector<32x4xf32>
    %9 = arith.mulf %4, %8 : vector<32x4xf32>
    %cst_7 = arith.constant dense<0.000000e+00> : vector<4xf32>
    %10 = vector.multi_reduction <add>, %9, %cst_7 [0] : vector<32x4xf32> to vector<4xf32>
    %11 = vector.shape_cast %10 : vector<4xf32> to vector<1x4xf32>
    %cst_8 = arith.constant 0.000000e+00 : f32
    %12 = vector.broadcast %cst_8 : f32 to vector<1x4xf32>
    %13 = arith.maximumf %11, %12 : vector<1x4xf32>
    %14 = vector.broadcast %13 : vector<1x4xf32> to vector<32x4xf32>
    %15 = arith.mulf %5, %14 : vector<32x4xf32>
    %cst_9 = arith.constant dense<0.000000e+00> : vector<32xf32>
    %16 = vector.multi_reduction <add>, %15, %cst_9 [1] : vector<32x4xf32> to vector<32xf32>
    %17 = vector.shape_cast %16 : vector<32xf32> to vector<32x1xf32>
    %cst_10 = arith.constant 0.000000e+00 : f32
    %18 = vector.broadcast %cst_10 : f32 to vector<32x1xf32>
    %19 = arith.subf %18, %17 : vector<32x1xf32>
    %20 = math.exp %19 : vector<32x1xf32>
    %cst_11 = arith.constant 1.000000e+00 : f32
    %21 = vector.broadcast %cst_11 : f32 to vector<32x1xf32>
    %22 = arith.addf %21, %20 : vector<32x1xf32>
    %cst_12 = arith.constant 1.000000e+00 : f32
    %23 = vector.broadcast %cst_12 : f32 to vector<32x1xf32>
    %24 = arith.divf %23, %22 : vector<32x1xf32>
    %25 = vector.broadcast %24 : vector<32x1xf32> to vector<32x256xf32>
    %26 = arith.mulf %1, %25 : vector<32x256xf32>
    %c0_13 = arith.constant 0 : index
    %c0_14 = arith.constant 0 : index
    %c0_15 = arith.constant 0 : index
    %27 = vector.load %arg4[%c0_13, %c0_14, %c0_15] : memref<1x32x256xf32, #tpu.memory_space<vmem>>, vector<1x32x256xf32>
    %28 = vector.shape_cast %27 : vector<1x32x256xf32> to vector<32x256xf32>
    %29 = vector.shape_cast %26 : vector<32x256xf32> to vector<1x32x256xf32>
    tpu.vector_store %arg4[%c0_13, %c0_14, %c0_15], %29 {strides = array<i32>} : memref<1x32x256xf32, #tpu.memory_space<vmem>>, vector<1x32x256xf32>,
    return
  }
  func.func @transform_0(%arg0: i32) -> (i32, i32, i32) {
    %c0_i32 = arith.constant 0 : i32
    %c0_i32_0 = arith.constant 0 : i32
    %c0_i32_1 = arith.constant 0 : i32
    return %arg0, %c0_i32, %c0_i32_0 : i32, i32, i32
  }
  func.func @transform_1(%arg0: i32) -> (i32, i32) {
    %c0_i32 = arith.constant 0 : i32
    %c0_i32_0 = arith.constant 0 : i32
    %c0_i32_1 = arith.constant 0 : i32
    return %c0_i32, %c0_i32_0 : i32, i32
  }
  func.func @transform_2(%arg0: i32) -> (i32, i32) {
    %c0_i32 = arith.constant 0 : i32
    %c0_i32_0 = arith.constant 0 : i32
    %c0_i32_1 = arith.constant 0 : i32
    return %c0_i32, %c0_i32_0 : i32, i32
  }
  func.func @transform_3(%arg0: i32) -> (i32, i32, i32) {
    %c0_i32 = arith.constant 0 : i32
    %c0_i32_0 = arith.constant 0 : i32
    %c0_i32_1 = arith.constant 0 : i32
    return %arg0, %c0_i32, %c0_i32_0 : i32, i32, i32
  }
}

</mosaic_0001>

<bundles_post_ra>
// kernel: tpu_custom_call.1
= control target key start
LH: loop header
LB: loop body
LE: loop exit
PB: predicated region body
PF: predicated region fallthrough
CT: control target
= control target key end

     0   :  { %8 = vsyncpa [#allocation3], 0  ;;  %s856_s0 = inlined_call_operand.hbm [shape: f32[2,32,256], index: 0, kind: input, shape index: {}]   ;;  %s857_s1 = inlined_call_operand.vmem [shape: f32[32,4], index: 1, kind: input, shape index: {}]   ;;  %s858_s2 = inlined_call_operand.vmem [shape: f32[32,4], index: 2, kind: input, shape index: {}]   ;;  %s859_s3 = inlined_call_operand.hbm [shape: f32[2,32,256], index: 3, kind: output, shape index: {}]  }
   0x1   :  { %10 = vsyncpa [#allocation3 + $0x1], 0 }
   0x2   :  { %11 = vsyncpa [#allocation4], 0 }
   0x3   :  { %13 = vsyncpa [#allocation4 + $0x1], 0  ;;  %s643_s12 = smov 0   ;;  %s645_s13 = smov 0  }
   0x4   :  { %s647_s14 = smov 0   ;;  %s649_s15 = smov 0  }
   0x5 LB: > { %s664_s16 = sadd.s32 4294967295, %s617_s15   ;;  %s439_s17 = sadd.s32 4294967294, %s617_s15   ;;  %s617_s15 = sphi %s649_s15, %s869_s15   ;;  %s613_s14 = sphi %s647_s14, %s868_s14   ;;  %s609_s13 = sphi %s645_s13, %s867_s13   ;;  %s605_s12 = sphi %s643_s12, %s866_s12  }
   0x6   : > { %s668_s18 = sadd.s32 1, %s617_s15   ;;  %s26_s19 = sadd.s32 1, %s613_s14 }
   0x7   : > { %s23_s20 = ssub.s32 %s617_s15, %s668_s18  ;;  %p33_p0 = scmp.ne.s32.totalorder %s613_s14, %s609_s13 }
   0x8   : > { %p24_p1 = scmp.eq.s32.totalorder %s23_s20, 0  ;;  %p34_p2 = scmp.eq.s32.totalorder %s617_s15, 0 }
   0x9   : > { %p39_p3 = scmp.ne.s32.totalorder %s609_s13, %s605_s12  ;;  %p40_p4 = scmp.eq.s32.totalorder %s664_s16, 0 }
   0xa   : > { %s680_s21 = scalar_select %p24_p1, %s613_s14, %s26_s19  }
   0xb   : > { %p682_p5 = por %p34_p2, %p33_p0  ;;  %p686_p6 = por %p40_p4, %p39_p3 }
   0xc   : > { %p105_p7 = scmp.eq.s32.totalorder %s664_s16, 1  ;;  %p111_p8 = scmp.eq.s32.totalorder %s439_s17, 1 }
   0xd   : > { %p467_p10 = scmp.lt.s32.totalorder %s617_s15, 2  ;;  %s137_s26 = sand.u32 1, %s613_s14  }
   0xe   : > { %p693_p11 = por %p105_p7, %p33_p0  ;;  %p697_p12 = por %p111_p8, %p39_p3 }
   0xf   : > { %s453_s27 = sshll.u32 %s617_s15, 6  ;;  %s442_s28 = sshll.u32 %s137_s26, 6 }
  0x10   : > { %s146_s4 = scalar_lea.hbm %s856_s0, %s453_s27  ;;  %s141_s6 = scalar_lea.vmem [#allocation2], %s442_s28 }
  0x11   : > { %s147_s5 = sshll.u32 %s146_s4, 4  ;;  %s149_s7 = sshll.u32 %s141_s6, 4  ;;  %s148_s5 = int_to_ptr.hbm [resolvable:$true] %s147_s5  ;;  %s150_s7 = int_to_ptr.vmem [resolvable:$true] %s149_s7 }
  0x12   : > { %p708_p13 = pnand %p467_p10, %p682_p5  ;;  %p445_p0 = scmp.ge.s32.totalorder %s617_s15, 1 }
  0x13   : > { %p157_p1 = scmp.lt.s32.totalorder %s617_s15, 3  ;;  %s138_s9 = scalar_lea.sflag [#allocation3], %s137_s26 }
  0x14   : > { %s521_s10 = sshra.s32 %s148_s5, 4  ;;  %p525_p3 = pneg %p708_p13  ;;  %s522_s10 = int_to_ptr.hbm [resolvable:$true] %s521_s10 }
  0x15   : > { %s523_s11 = scalar_lea.hbm %s522_s10, 64  ;;  %s528_s20 = scalar_lea.hbm %s856_s0, 128 }
  0x16   : > { %p524_p2 = scmp.ne.s32.totalorder %s522_s10, %s523_s11  ;;  %p529_p5 = scmp.lt.s32.totalorder %s522_s10, %s856_s0 }
  0x17   : > { %p530_p8 = scmp.lt.s32.totalorder %s528_s20, %s523_s11 }
  0x18   : > { %p526_p4 = pnand %p525_p3, %p524_p2 }
  0x19   : > { %p531_p10 = por %p530_p8, %p529_p5 }
  0x1a   : > { %p527_p7 = pneg %p526_p4 }
  0x1c   : > { %p532_p9 = pnand %p531_p10, %p527_p7 }
  0x1e   : > { %535 = shalt.err (!%p532_p9)
}
  0x1f   : > { %s619_s26 = smov 256   ;;  %s620_s28 = smov 16  }
  0x20   : > { %462 = dma.hbm_to_vmem [thread:$0]  (!%p708_p13), %s148_s5, 1024, %s150_s7, %s138_s9, %s619_s26, %s619_s26, %s620_s28  }
  0x21   : > { %p158_p2 = pnand %p445_p0, %p157_p1 }
  0x22   : > { %s729_s29 = sand.u32 (!%p158_p2), 1, %s609_s13  }
  0x23   : > { %161 = sbr.rel (%p158_p2) target bundleno = 360 (0x168), region = 32  ;;  %s446_s30 = sshll.u32 (!%p158_p2), %s729_s29, 6 }
  0x24   : > { %s164_s4 = scalar_lea.sflag (!%p158_p2), [#allocation3], %s729_s29  ;;  %s167_s6 = scalar_lea.vmem (!%p158_p2), [#allocation2], %s446_s30 }
  0x28   : > { %596 = dma.done.wait (%p686_p6), %s164_s4, 1024  }
  0x29   : > { %598 = vsyncadd (%p686_p6), %s164_s4, 4294966272  ;;  %v739_v0 = vld [vmem:[%s167_s6] sm:$0xff]  ;;  %v741_v1 = vld [vmem:[%s167_s6 + $0x8] sm:$0xff]  ;;  %vm227_vm0 = vcmask 31744   ;;  %s805_s23 = scalar_lea.vmem [#allocation5], %s446_s30  ;;  %s454_s5 = sshll.u32 %s664_s16, 6 }
  0x2a   : > { %v743_v2 = vld [vmem:[%s167_s6 + $0x20] sm:$0xff]  ;;  %v199_v3 = vadd.f32 %v741_v1, %v739_v0  ;;  %v747_v4 = vld [vmem:[%s167_s6 + $0x28] sm:$0xff]  ;;  %v751_v6 = vld [vmem:[%s167_s6 + $0x10] sm:$0xff]  ;;  %s362_s16 = scalar_lea.hbm %s859_s3, %s454_s5  ;;  %s363_s8 = sshll.u32 %s805_s23, 4  ;;  %s364_s8 = int_to_ptr.vmem [resolvable:$true] %s363_s8 }
  0x2b   : > { %v205_v5 = vadd.f32 %v747_v4, %v743_v2  ;;  %v753_v7 = vld [vmem:[%s167_s6 + $0x18] sm:$0xff]  ;;  %v755_v8 = vld [vmem:[%s167_s6 + $0x30] sm:$0xff]  ;;  %v211_v15 = vld [vmem:[%s857_s1] sm:$0xff]  ;;  %s365_s9 = sshll.u32 %s362_s16, 4  ;;  %s351_s10 = scalar_lea.sflag [#allocation4], %s729_s29  ;;  %s366_s9 = int_to_ptr.hbm [resolvable:$true] %s365_s9 }
  0x2c   : > { %200 = vadd.xlane.f32.xlu0 %v199_v3  ;;  %v757_v9 = vld [vmem:[%s167_s6 + $0x38] sm:$0xff]  ;;  %v202_v10 = vadd.f32 %v753_v7, %v751_v6  ;;  %v213_v17 = vld [vmem:[%s857_s1 + $0x10] sm:$0xff]  ;;  %v212_v18 = vld [vmem:[%s857_s1 + $0x8] sm:$0xff]  ;;  %s565_s11 = sshra.s32 %s366_s9, 4  ;;  %s571_s22 = scalar_lea.hbm %s859_s3, 128  ;;  %s566_s11 = int_to_ptr.hbm [resolvable:$true] %s565_s11 }
  0x2d   : > { %206 = vadd.xlane.f32.xlu1 %v205_v5  ;;  %v208_v11 = vadd.f32 %v757_v9, %v755_v8  ;;  %v214_v22 = vld [vmem:[%s857_s1 + $0x18] sm:$0xff]  ;;  %v217_v42 = vld [vmem:[%s858_s2 + $0x10] sm:$0xff]  ;;  %v215_v43 = vld [vmem:[%s858_s2] sm:$0xff]  ;;  %s567_s17 = scalar_lea.hbm %s566_s11, 64  ;;  %p572_p0 = scmp.lt.s32.totalorder %s566_s11, %s859_s3 }
  0x2e   : > { %v218_v41 = vld [vmem:[%s858_s2 + $0x18] sm:$0xff]  ;;  %v216_v51 = vld [vmem:[%s858_s2 + $0x8] sm:$0xff]  ;;  %p568_p6 = scmp.ne.s32.totalorder %s566_s11, %s567_s17  ;;  %p573_p1 = scmp.lt.s32.totalorder %s571_s22, %s567_s17 }
  0x30   : > { %p569_p9 = pnand %p568_p6, %p693_p11  ;;  %p574_p3 = por %p573_p1, %p572_p0 }
  0x32   : > { %p570_p13 = pneg %p569_p9 }
  0x34   : > { %203 = vadd.xlane.f32.xlu0 %v202_v10  ;;  %p575_p4 = pnand %p574_p3, %p570_p13 }
  0x35   : > { %209 = vadd.xlane.f32.xlu1 %v208_v11 }
  0x9f   : > { %v201_v12 = vpop.xlane.xlu0 %200 }
  0xa0   : > { %v207_v13 = vpop.xlane.xlu1 %206  ;;  %v219_v14 = vmul.f32 0.00390625, %v201_v12 }
  0xa1   : > { %v221_v16 = vmul.f32 0.00390625, %v207_v13 }
  0xa2   : > { %v223_v20 = vmul.f32 %v219_v14, %v211_v15 }
  0xa3   : > { %v225_v25 = vmul.f32 %v221_v16, %v213_v17 }
  0xa4   : > { %v228_v28 = vsel %vm227_vm0, %v223_v20, 0.0 }
  0xa5   : > { %v231_v31 = vsel %vm227_vm0, %v225_v25, 0.0 }
  0xa7   : > { %v204_v19 = vpop.xlane.xlu0 %203 }
  0xa8   : > { %v220_v21 = vmul.f32 0.00390625, %v204_v19  ;;  %v210_v23 = vpop.xlane.xlu1 %209 }
  0xa9   : > { %v222_v24 = vmul.f32 0.00390625, %v210_v23 }
  0xaa   : > { %v224_v26 = vmul.f32 %v220_v21, %v212_v18 }
  0xab   : > { %v226_v27 = vmul.f32 %v222_v24, %v214_v22 }
  0xac   : > { %v229_v29 = vsel %vm227_vm0, %v224_v26, 0.0 }
  0xad   : > { %v230_v30 = vadd.f32 %v229_v29, %v228_v28  ;;  %v233_v32 = vsel %vm227_vm0, %v226_v27, 0.0 }
  0xaf   : > { %v232_v33 = vadd.f32 %v231_v31, %v230_v30 }
  0xb1   : > { %v234_v34 = vadd.f32 %v233_v32, %v232_v33 }
  0xb3   : > { %v235_v35 = vrot.slane %v234_v34, 4 }
  0xb5   : > { %v236_v36 = vadd.f32 %v235_v35, %v234_v34 }
  0xb7   : > { %v237_v37 = vrot.slane %v236_v36, 2 }
  0xb9   : > { %v238_v38 = vadd.f32 %v237_v37, %v236_v36 }
  0xbb   : > { %v239_v39 = vrot.slane %v238_v38, 1 }
  0xbd   : > { %v240_v40 = vadd.f32 %v239_v39, %v238_v38 }
  0xbf   : > { %v241_v44 = vmax.f32 %v240_v40, 0.0 }
  0xc1   : > { %v245_v45 = vmul.f32 %v241_v44, %v218_v41  ;;  %v244_v46 = vmul.f32 %v241_v44, %v217_v42  ;;  %v242_v47 = vmul.f32 %v241_v44, %v215_v43  ;;  %v243_v52 = vmul.f32 %v241_v44, %v216_v51 }
  0xc3   : > { %v255_v48 = vsel %vm227_vm0, %v245_v45, 0.0  ;;  %v252_v49 = vsel %vm227_vm0, %v244_v46, 0.0  ;;  %v246_v50 = vsel %vm227_vm0, %v242_v47, 0.0  ;;  %v249_v53 = vsel %vm227_vm0, %v243_v52, 0.0 }
  0xc4   : > { %256 = vadd.xlane.f32.xlu1 %v255_v48  ;;  %253 = vadd.xlane.f32.xlu0 %v252_v49 }
  0xc5   : > { %247 = vadd.xlane.f32.xlu2 %v246_v50 }
  0xcd   : > { %250 = vadd.xlane.f32.xlu2 %v249_v53 }
 0x137   : > { %v257_v54 = vpop.xlane.xlu1 %256  ;;  %v254_v55 = vpop.xlane.xlu0 %253 }
 0x138   : > { %v261_v56 = vsub.f32 0.0, %v257_v54  ;;  %v260_v57 = vsub.f32 0.0, %v254_v55  ;;  %v248_v58 = vpop.xlane.xlu2 %247 }
 0x139   : > { %v258_v59 = vsub.f32 0.0, %v248_v58 }
 0x13a   : > { %v268_v60 = vmul.f32 1.442695, %v261_v56  ;;  %v266_v61 = vmul.f32 1.442695, %v260_v57 }
 0x13b   : > { %v262_v62 = vmul.f32 1.442695, %v258_v59 }
 0x13c   : > { %505 = vpow2.f32 %v268_v60 }
 0x13d   : > { %507 = vpow2.f32 %v266_v61 }
 0x13e   : > { %509 = vpow2.f32 %v262_v62 }
 0x140   : > { %v251_v63 = vpop.xlane.xlu2 %250 }
 0x141   : > { %v259_v3 = vsub.f32 0.0, %v251_v63 }
 0x142   : > { %v506_v5 = vpop.eup %505 }
 0x143   : > { %v508_v10 = vpop.eup %507  ;;  %v273_v11 = vadd.f32 1.0, %v506_v5  ;;  %v264_v12 = vmul.f32 1.442695, %v259_v3 }
 0x144   : > { %v510_v13 = vpop.eup %509  ;;  %v272_v14 = vadd.f32 1.0, %v508_v10 }
 0x145   : > { %511 = vrcp.f32 %v273_v11  ;;  %v270_v15 = vadd.f32 1.0, %v510_v13  ;;  %v328_v22 = vand.u32 2147483647, %v273_v11  ;;  %v330_v25 = vand.u32 2147483648, %v273_v11 }
 0x146   : > { %513 = vrcp.f32 %v272_v14  ;;  %v315_v27 = vand.u32 2147483648, %v272_v14  ;;  %vm324_vm2 = vweird.f32 %v273_v11  ;;  %v313_v31 = vand.u32 2147483647, %v272_v14 }
 0x147   : > { %515 = vpow2.f32 %v264_v12  ;;  %vm329_vm4 = vcmp.eq.f32.partialorder %v328_v22, 8.507059e+37  ;;  %vm309_vm5 = vweird.f32 %v272_v14  ;;  %v331_v34 = vor.u32 1.1754944e-38, %v330_v25 }
 0x148   : > { %517 = vrcp.f32 %v270_v15  ;;  %v316_v36 = vor.u32 1.1754944e-38, %v315_v27  ;;  %v285_v37 = vand.u32 2147483648, %v270_v15  ;;  %v283_v40 = vand.u32 2147483647, %v270_v15 }
 0x149   : > { %vm314_vm9 = vcmp.eq.f32.partialorder %v313_v31, 8.507059e+37  ;;  %vm279_vm10 = vweird.f32 %v270_v15 }
 0x14a   : > { %v286_v50 = vor.u32 1.1754944e-38, %v285_v37  ;;  %vm284_vm12 = vcmp.eq.f32.partialorder %v283_v40, 8.507059e+37 }
 0x14b   : > { %v512_v16 = vpop.eup %511 }
 0x14c   : > { %v514_v17 = vpop.eup %513  ;;  %v320_v18 = vmul.f32 %v512_v16, %v273_v11  ;;  %vm325_vm1 = vweird.f32 %v512_v16 }
 0x14d   : > { %v516_v19 = vpop.eup %515  ;;  %v305_v20 = vmul.f32 %v514_v17, %v272_v14  ;;  %vm310_vm3 = vweird.f32 %v514_v17  ;;  %vm326_vm6 = vmor %vm324_vm2, %vm325_vm1 }
 0x14e   : > { %v321_v21 = vsub.f32 1.0, %v320_v18  ;;  %v795_v23 = vadd.f32 1.0, %v516_v19  ;;  %v518_v24 = vpop.eup %517  ;;  %vm311_vm7 = vmor %vm309_vm5, %vm310_vm3 }
 0x14f   : > { %v306_v26 = vsub.f32 1.0, %v305_v20  ;;  %v275_v29 = vmul.f32 %v518_v24, %v270_v15  ;;  %vm280_vm8 = vweird.f32 %v518_v24 }
 0x150   : > { %v322_v28 = vmul.f32 %v512_v16, %v321_v21  ;;  %519 = vrcp.f32 %v795_v23  ;;  %vm281_vm11 = vmor %vm279_vm10, %vm280_vm8  ;;  %v300_v53 = vand.u32 2147483648, %v795_v23  ;;  %v298_v55 = vand.u32 2147483647, %v795_v23 }
 0x151   : > { %v307_v30 = vmul.f32 %v514_v17, %v306_v26  ;;  %v276_v33 = vsub.f32 1.0, %v275_v29  ;;  %vm294_vm14 = vweird.f32 %v795_v23 }
 0x152   : > { %v323_v32 = vadd.f32 %v512_v16, %v322_v28  ;;  %vm299_vm0 = vcmp.eq.f32.partialorder %v298_v55, 8.507059e+37 }
 0x153   : > { %v308_v35 = vadd.f32 %v514_v17, %v307_v30  ;;  %v277_v39 = vmul.f32 %v518_v24, %v276_v33 }
 0x154   : > { %v327_v38 = vsel %vm326_vm6, %v512_v16, %v323_v32 }
 0x155   : > { %v332_v41 = vsel %vm329_vm4, %v331_v34, %v327_v38  ;;  %v312_v42 = vsel %vm311_vm7, %v514_v17, %v308_v35  ;;  %v278_v47 = vadd.f32 %v518_v24, %v277_v39 }
 0x156   : > { %v520_v43 = vpop.eup %519  ;;  %v340_v44 = vmul.f32 %v332_v41, %v755_v8  ;;  %v341_v45 = vmul.f32 %v332_v41, %v757_v9  ;;  %v317_v46 = vsel %vm314_vm9, %v316_v36, %v312_v42 }
 0x157   : > { %v338_v48 = vmul.f32 %v317_v46, %v743_v2  ;;  %v339_v49 = vmul.f32 %v317_v46, %v747_v4  ;;  %v290_v51 = vmul.f32 %v520_v43, %v795_v23  ;;  %v282_v8 = vsel %vm281_vm11, %v518_v24, %v278_v47 }
 0x158   : > { %348 = vst [vmem:[%s805_s23 + $0x30] sm:$0xff] %v340_v44  ;;  %v287_v2 = vsel %vm284_vm12, %v286_v50, %v282_v8  ;;  %vm295_vm13 = vweird.f32 %v520_v43 }
 0x159   : > { %349 = vst [vmem:[%s805_s23 + $0x38] sm:$0xff] %v341_v45  ;;  %v291_v4 = vsub.f32 1.0, %v290_v51  ;;  %v334_v9 = vmul.f32 %v287_v2, %v739_v0  ;;  %v335_v52 = vmul.f32 %v287_v2, %v741_v1  ;;  %vm296_vm15 = vmor %vm294_vm14, %vm295_vm13  ;;  %v301_v0 = vor.u32 1.1754944e-38, %v300_v53 }
 0x15a   : > { %346 = vst [vmem:[%s805_s23 + $0x20] sm:$0xff] %v338_v48 }
 0x15b   : > { %347 = vst [vmem:[%s805_s23 + $0x28] sm:$0xff] %v339_v49  ;;  %v292_v54 = vmul.f32 %v520_v43, %v291_v4 }
 0x15c   : > { %342 = vst [vmem:[%s805_s23] sm:$0xff] %v334_v9 }
 0x15d   : > { %343 = vst [vmem:[%s805_s23 + $0x8] sm:$0xff] %v335_v52  ;;  %v293_v56 = vadd.f32 %v520_v43, %v292_v54 }
 0x15f   : > { %v297_v1 = vsel %vm296_vm15, %v520_v43, %v293_v56 }
 0x160   : > { %v302_v57 = vsel %vm299_vm0, %v301_v0, %v297_v1 }
 0x161   : > { %v336_v58 = vmul.f32 %v302_v57, %v751_v6  ;;  %v337_v59 = vmul.f32 %v302_v57, %v753_v7 }
 0x163   : > { %344 = vst [vmem:[%s805_s23 + $0x10] sm:$0xff] %v336_v58 }
 0x164   : > { %345 = vst [vmem:[%s805_s23 + $0x18] sm:$0xff] %v337_v59 }
 0x165   : > { %578 = shalt.err (!%p575_p4)
}
 0x166   : > { %s621_s29 = smov 256   ;;  %s622_s28 = smov 16  }
 0x167   : > { %457 = dma.vmem_to_hbm [thread:$0]  (%p693_p11), %s364_s8, 1024, %s366_s9, %s351_s10, %s621_s29, %s621_s29, %s622_s28  }
 0x168 PF: > { %s380_s4 = sand.u32 1, %s605_s12   ;;  %p865_p7 = scmp.ge.s32.totalorder %s617_s15, 2 }
 0x169   : > { %s381_s6 = scalar_lea.sflag [#allocation4], %s380_s4 }
 0x16a   : > { %p464_p5 = pnand %p865_p7, %p697_p12 }
 0x16c   : > { %p465_p8 = pneg %p464_p5 }
 0x16e   : > { %600 = dma.done.wait (%p465_p8), %s381_s6, 1024  }
 0x16f   : > { %602 = vsyncadd (%p465_p8), %s381_s6, 4294966272  ;;  %p16_p10 = scmp.ge.s32.totalorder %s668_s18, 4   ;;  %s866_s12 = smov %s609_s13 }
 0x170   : > { %s867_s13 = smov %s613_s14  ;;  %s868_s14 = smov %s680_s21 }
 0x171   : > { %s869_s15 = smov %s668_s18  ;;  %18 = sbr.rel (!%p16_p10) target bundleno = 5 (0x5), region = 77 }
 0x176   :  { %387 = vsyncpa [#allocation3], 1 }
 0x177   :  { %389 = vsyncpa [#allocation3 + $0x1], 1 }
 0x178   :  { %390 = vsyncpa [#allocation4], 1 }
 0x179   :  { %392 = vsyncpa [#allocation4 + $0x1], 1 }

</bundles_post_ra>
